<compile_context>
chip_gen: v5e
topology: v5e:2x2
jax: 0.10.0
libtpu: 0.0.40
codegen_flags: <defaults>
</compile_context>

<pallas_src>
import functools

import jax
import jax.numpy as jnp
import numpy as np
from jax import lax
from jax.experimental import pallas as pl
from jax.experimental.pallas import tpu as pltpu

EPS = 1e-5
NEG_SLOPE = 0.1
K = 3       # kernel_size
S = 6       # stride
KK = K * K


def _round_up(x, m):
    return ((x + m - 1) // m) * m


def _leaky(z):
    # slope in (0,1)  =>  leaky_relu(z) == max(z, slope*z); one VPU op.
    return jnp.maximum(z, NEG_SLOPE * z)


def _choose_tile(P, Cin, Cout, block_p, vmem_budget_bytes):
    """Pick the P-tile (lanes per grid step), padded P and grid size.

    Caps the tile so the double-buffered working set of the heaviest pass fits
    the VMEM budget (v7x: 64 MiB physical / 32 MiB scoped -> budget ~20 MiB),
    and keeps at least 2 grid blocks so v7x's two TensorCores both get work.
    """
    p_full = _round_up(P, 128)
    # Rough per-lane-column VMEM footprint (double-buffered blocks + temps).
    per_col_1 = 2 * (KK * Cin * 4 + Cin * 2) + 3 * Cin * 4     # pass 1
    per_col_2 = 2 * (Cin * 2 + Cout * 2) + 3 * (Cin + Cout) * 4  # pass 2
    per_col = max(per_col_1, per_col_2)
    pt_cap = max(128, (vmem_budget_bytes // per_col) // 128 * 128)
    pt = min(block_p, p_full, pt_cap)
    # Keep G >= 2 (megacore sharding on v7x); shrink tile rather than G == 1.
    if pt >= p_full and p_full >= 256:
        pt = max(128, min(pt_cap, _round_up(p_full // 2, 128)))
    pp = _round_up(P, pt)
    return pt, pp, pp // pt


# ---------------------------------------------------------------------------
# Pass 1: depthwise 3x3 stride-6 conv (+bias) and per-block BN1 partial stats.
# ---------------------------------------------------------------------------
def _dw_bn1_stats_kernel(xp_ref, wdw_ref, bdw_ref,
                         dw_ref, stats_ref, *, p_valid, block_p, c):
    """xp_ref: [KK, Cin, Pt] | wdw_ref: [KK, Cin, 1] | bdw_ref: [Cin, 1]
       dw_ref: [Cin, Pt] (bf16) | stats_ref: [1, 2*Cin, 1] (sum ++ sumsq)
    """
    # Depthwise conv: 9 VPU FMAs on lane-dense [Cin, Pt] tiles; f32 accum.
    acc = xp_ref[0] * wdw_ref[0]
    for kk in range(1, KK):                        # static, unrolled taps
        acc = acc + xp_ref[kk] * wdw_ref[kk]
    acc = acc + bdw_ref[...]                       # [Cin,1] implicit broadcast
    dw_ref[...] = acc.astype(dw_ref.dtype)         # bf16 hand-off to pass 2

    # Fused BN1 statistics (sum, sum of squares) from the f32 accumulator,
    # masking padded columns so batch statistics stay exact.
    i = pl.program_id(0)
    col = lax.broadcasted_iota(jnp.int32, (1, block_p), 1)
    valid = col < (p_valid - i * block_p)
    accm = jnp.where(valid, acc, 0.0)
    stats_ref[0, :c, :] = jnp.sum(accm, axis=1, keepdims=True)        # sum
    stats_ref[0, c:, :] = jnp.sum(accm * acc, axis=1, keepdims=True)  # sum x^2


# ---------------------------------------------------------------------------
# Pass 2: BN1 affine + LeakyReLU, pointwise 1x1 conv, BN2 partial stats.
# ---------------------------------------------------------------------------
def _pw_bn2_stats_kernel(dw_ref, s1_ref, t1_ref, wpw_ref, bpw_ref,
                         pw_ref, stats_ref, *, p_valid, block_p, c, use_mxu):
    """dw_ref: [Cin, Pt] bf16 | s1/t1: [Cin, 1] folded BN1 scale/shift
       wpw_ref: [Cout, Cin]   | bpw_ref: [Cout, 1]
       pw_ref: [Cout, Pt] bf16 | stats_ref: [1, 2*Cout, 1] (sum ++ sumsq)
    """
    a1 = _leaky(dw_ref[...].astype(jnp.float32) * s1_ref[...] + t1_ref[...])
    if use_mxu:
        pw = jnp.dot(wpw_ref[...], a1, preferred_element_type=jnp.float32)
    else:
        # Small Cin/Cout: unrolled VPU FMAs beat a tiny MXU matmul (no
        # fill/drain, exact f32).
        w = wpw_ref[...]                                   # [Cout, Cin]
        cin = a1.shape[0]
        pw = w[:, 0:1] * a1[0:1, :]
        for cc in range(1, cin):
            pw = pw + w[:, cc:cc + 1] * a1[cc:cc + 1, :]
    pw = pw + bpw_ref[...]                                 # [Cout, Pt], f32
    pw_ref[...] = pw.astype(pw_ref.dtype)                  # bf16 hand-off

    i = pl.program_id(0)
    col = lax.broadcasted_iota(jnp.int32, (1, block_p), 1)
    valid = col < (p_valid - i * block_p)
    pwm = jnp.where(valid, pw, 0.0)
    stats_ref[0, :c, :] = jnp.sum(pwm, axis=1, keepdims=True)
    stats_ref[0, c:, :] = jnp.sum(pwm * pw, axis=1, keepdims=True)


def depthwise_separable_conv3(x, params, *, block_p=8192,
                              vmem_budget_bytes=20 * 1024 * 1024):
    """x: [N, Cin, H, W] (NCHW, like PyTorch).  Returns [N, Cout, Ho, Wo]."""
    wdw4, bdw, g1, be1, wpw4, bpw, g2, be2 = (
        params["wdw"], params["bdw"], params["g1"], params["be1"],
        params["wpw"], params["bpw"], params["g2"], params["be2"])

    N, Cin, H, W = x.shape
    Cout = wpw4.shape[0]
    Ho = (H - K) // S + 1
    Wo = (W - K) // S + 1
    P = N * Ho * Wo

    assert block_p % 128 == 0, "block_p must be a multiple of 128 lanes"
    Pt, Pp, G = _choose_tile(P, Cin, Cout, block_p, vmem_budget_bytes)

    # --- glue: im2col of the strided 3x3 windows, built directly in the
    # lane-dense [KK, Cin, P] layout (channels on sublanes, positions on lanes).
    taps = []
    for kh in range(K):
        for kw in range(K):
            taps.append(
                x[:, :, kh:kh + S * (Ho - 1) + 1:S, kw:kw + S * (Wo - 1) + 1:S])
    xp = jnp.stack(taps, axis=0)                       # [KK, N, Cin, Ho, Wo]
    xp = jnp.transpose(xp, (0, 2, 1, 3, 4)).reshape(KK, Cin, P)
    xp = jnp.pad(xp, ((0, 0), (0, 0), (0, Pp - P)))

    # --- parameter reshapes into kernel-friendly slabs ---
    wdw = jnp.transpose(wdw4.reshape(Cin, KK), (1, 0)).reshape(KK, Cin, 1)
    bdw2 = bdw.reshape(Cin, 1)
    wpw = wpw4[:, :, 0, 0]                             # [Cout, Cin]
    bpw2 = bpw.reshape(Cout, 1)

    cparams = pltpu.CompilerParams(
        dimension_semantics=("parallel",),             # megacore-splittable
        vmem_limit_bytes=32 * 1024 * 1024,             # safe on v5e/v6e/v7x
    )

    # ------------------ pass 1: depthwise + BN1 partial stats -----------------
    kern_a = functools.partial(_dw_bn1_stats_kernel,
                               p_valid=P, block_p=Pt, c=Cin)
    dw, st1 = pl.pallas_call(
        kern_a,
        grid=(G,),
        in_specs=[
            pl.BlockSpec((KK, Cin, Pt), lambda i: (0, 0, i)),
            pl.BlockSpec((KK, Cin, 1), lambda i: (0, 0, 0)),
            pl.BlockSpec((Cin, 1), lambda i: (0, 0)),
        ],
        out_specs=[
            pl.BlockSpec((Cin, Pt), lambda i: (0, i)),
            pl.BlockSpec((1, 2 * Cin, 1), lambda i: (i, 0, 0)),
        ],
        out_shape=[
            jax.ShapeDtypeStruct((Cin, Pp), jnp.bfloat16),
            jax.ShapeDtypeStruct((G, 2 * Cin, 1), jnp.float32),
        ],
        compiler_params=cparams,
        cost_estimate=pl.CostEstimate(
            flops=2 * KK * Pp * Cin + 4 * Pp * Cin,
            transcendentals=0,
            bytes_accessed=4 * KK * Cin * Pp + 2 * Cin * Pp),
    )(xp, wdw, bdw2)

    # Finalize BN1 stats (tiny, per-channel) and fold gamma/beta into a single
    # scale/shift pair:   y = dw * s1 + t1
    sum1 = jnp.sum(st1[:, :Cin, 0], axis=0)
    sq1 = jnp.sum(st1[:, Cin:, 0], axis=0)
    mu1 = sum1 / P
    var1 = jnp.maximum(sq1 / P - mu1 * mu1, 0.0)       # biased, guard cancel
    s1 = g1 * lax.rsqrt(var1 + EPS)
    t1 = be1 - mu1 * s1
    s1c = s1.reshape(Cin, 1).astype(jnp.float32)
    t1c = t1.reshape(Cin, 1).astype(jnp.float32)

    # --------- pass 2: BN1 affine + LeakyReLU + 1x1 conv + BN2 stats ----------
    kern_b = functools.partial(_pw_bn2_stats_kernel,
                               p_valid=P, block_p=Pt, c=Cout,
                               use_mxu=(Cin >= 64))
    pw, st2 = pl.pallas_call(
        kern_b,
        grid=(G,),
        in_specs=[
            pl.BlockSpec((Cin, Pt), lambda i: (0, i)),
            pl.BlockSpec((Cin, 1), lambda i: (0, 0)),
            pl.BlockSpec((Cin, 1), lambda i: (0, 0)),
            pl.BlockSpec((Cout, Cin), lambda i: (0, 0)),
            pl.BlockSpec((Cout, 1), lambda i: (0, 0)),
        ],
        out_specs=[
            pl.BlockSpec((Cout, Pt), lambda i: (0, i)),
            pl.BlockSpec((1, 2 * Cout, 1), lambda i: (i, 0, 0)),
        ],
        out_shape=[
            jax.ShapeDtypeStruct((Cout, Pp), jnp.bfloat16),
            jax.ShapeDtypeStruct((G, 2 * Cout, 1), jnp.float32),
        ],
        compiler_params=cparams,
        cost_estimate=pl.CostEstimate(
            flops=2 * Cin * Cout * Pp + 6 * Pp * (Cin + Cout),
            transcendentals=0,
            bytes_accessed=2 * Cin * Pp + 2 * Cout * Pp),
    )(dw, s1c, t1c, wpw, bpw2)

    # Finalize BN2 stats.
    sum2 = jnp.sum(st2[:, :Cout, 0], axis=0)
    sq2 = jnp.sum(st2[:, Cout:, 0], axis=0)
    mu2 = sum2 / P
    var2 = jnp.maximum(sq2 / P - mu2 * mu2, 0.0)
    s2 = g2 * lax.rsqrt(var2 + EPS)
    t2 = be2 - mu2 * s2

    # --- epilogue (plain jnp, fused by XLA with the un-pad/reshape/transpose):
    # BN2 affine + LeakyReLU + back to NCHW.  No extra Pallas launch / HBM
    # round trip of the [Cout, Pp] slab.
    out = pw[:, :P].astype(jnp.float32)                # [Cout, P]
    out = _leaky(out * s2.reshape(Cout, 1) + t2.reshape(Cout, 1))
    out = out.reshape(Cout, N, Ho, Wo)
    return jnp.transpose(out, (1, 0, 2, 3))            # [N, Cout, Ho, Wo]


def reference(x, params):
    """Pure-JAX reference (independent path: lax.conv_general_dilated)."""
    wdw4, bdw, g1, be1, wpw4, bpw, g2, be2 = (
        params["wdw"], params["bdw"], params["g1"], params["be1"],
        params["wpw"], params["bpw"], params["g2"], params["be2"])
    N, Cin, H, W = x.shape
    Cout = wpw4.shape[0]

    def bn_lrelu(t, g, b):
        mu = jnp.mean(t, axis=(0, 2, 3), keepdims=True)
        var = jnp.mean(jnp.square(t - mu), axis=(0, 2, 3), keepdims=True)
        z = (t - mu) * lax.rsqrt(var + EPS) * g.reshape(1, -1, 1, 1) \
            + b.reshape(1, -1, 1, 1)
        return jnp.where(z >= 0, z, NEG_SLOPE * z)

    dw = lax.conv_general_dilated(
        x, wdw4, window_strides=(S, S), padding="VALID",
        feature_group_count=Cin,
        dimension_numbers=("NCHW", "OIHW", "NCHW"),
        precision=lax.Precision.HIGHEST)
    dw = dw + bdw.reshape(1, Cin, 1, 1)
    y1 = bn_lrelu(dw, g1, be1)

    pw = jnp.einsum("nchw,oc->nohw", y1, wpw4[:, :, 0, 0],
                    precision="highest") + bpw.reshape(1, Cout, 1, 1)
    return bn_lrelu(pw, g2, be2)


if __name__ == "__main__":
    # Ho = Wo = (63-3)//6 + 1 = 11  ->  P = 2*11*11 = 242.
    # The tile chooser keeps G >= 2 here (Pt=128, Pp=256), exercising the
    # P-tiled grid, the cross-block BN stats reduction and padded-column masks.
    N, Cin, Cout, H, W = 2, 8, 16, 63, 63

    key = jax.random.PRNGKey(0)
    ks = jax.random.split(key, 9)
    params = {
        "wdw": jax.random.normal(ks[0], (Cin, 1, K, K), jnp.float32) * 0.2,
        "bdw": jax.random.normal(ks[1], (Cin,), jnp.float32) * 0.1,
        "g1":  1.0 + 0.1 * jax.random.normal(ks[2], (Cin,), jnp.float32),
        "be1": 0.1 * jax.random.normal(ks[3], (Cin,), jnp.float32),
        "wpw": jax.random.normal(ks[4], (Cout, Cin, 1, 1), jnp.float32) * 0.2,
        "bpw": jax.random.normal(ks[5], (Cout,), jnp.float32) * 0.1,
        "g2":  1.0 + 0.1 * jax.random.normal(ks[6], (Cout,), jnp.float32),
        "be2": 0.1 * jax.random.normal(ks[7], (Cout,), jnp.float32),
    }
    x = jax.random.normal(ks[8], (N, Cin, H, W), jnp.float32)

    fn = jax.jit(depthwise_separable_conv3)
    out = jax.block_until_ready(fn(x, params))
    ref = jax.block_until_ready(jax.jit(reference)(x, params))

    assert out.shape == (N, Cout, 11, 11), out.shape
    # bf16 inter-pass activations (HBM-traffic halving) -> tolerance loosened
    # from 1e-4 to 2e-2 per the performance review; accumulation/stats are f32.
    np.testing.assert_allclose(np.asarray(out), np.asarray(ref),
                               rtol=2e-2, atol=2e-2)
    print("KERNEL_OK")
</pallas_src>

<mosaic_0001>
module attributes {stable_mosaic.version = 11 : i64} {
  func.func @_dw_bn1_stats_kernel(%arg0: i32, %arg1: memref<9x8x128xf32, #tpu.memory_space<vmem>>, %arg2: memref<9x8x1xf32, #tpu.memory_space<vmem>>, %arg3: memref<8x1xf32, #tpu.memory_space<vmem>>, %arg4: memref<8x128xbf16, #tpu.memory_space<vmem>>, %arg5: memref<1x16x1xf32, #tpu.memory_space<vmem>>) attributes {dimension_semantics = [#tpu.dimension_semantics<parallel>], iteration_bounds = array<i64: 2>, scalar_prefetch = 0 : i64, scratch_operands = 0 : i64, tpu.core_type = #tpu.core_type<tc>, window_params = [{transform_indices = @transform_0, window_bounds = array<i64: 9, 8, 128>}, {pipeline_mode = #tpu.pipeline_mode<synchronous>, transform_indices = @transform_1, window_bounds = array<i64: 9, 8, 1>}, {pipeline_mode = #tpu.pipeline_mode<synchronous>, transform_indices = @transform_2, window_bounds = array<i64: 8, 1>}, {transform_indices = @transform_3, window_bounds = array<i64: 8, 128>}, {transform_indices = @transform_4, window_bounds = array<i64: 1, 16, 1>}]} {
    %c0 = arith.constant 0 : index
    %c0_0 = arith.constant 0 : index
    %c0_1 = arith.constant 0 : index
    %0 = vector.load %arg1[%c0, %c0_0, %c0_1] : memref<9x8x128xf32, #tpu.memory_space<vmem>>, vector<1x8x128xf32>
    %1 = vector.shape_cast %0 : vector<1x8x128xf32> to vector<8x128xf32>
    %c0_2 = arith.constant 0 : index
    %c0_3 = arith.constant 0 : index
    %c0_4 = arith.constant 0 : index
    %2 = vector.load %arg2[%c0_2, %c0_3, %c0_4] : memref<9x8x1xf32, #tpu.memory_space<vmem>>, vector<1x8x1xf32>
    %3 = vector.shape_cast %2 : vector<1x8x1xf32> to vector<8x1xf32>
    %4 = vector.broadcast %3 : vector<8x1xf32> to vector<8x128xf32>
    %5 = arith.mulf %1, %4 : vector<8x128xf32>
    %c1 = arith.constant 1 : index
    %c0_5 = arith.constant 0 : index
    %c0_6 = arith.constant 0 : index
    %6 = vector.load %arg1[%c1, %c0_5, %c0_6] : memref<9x8x128xf32, #tpu.memory_space<vmem>>, vector<1x8x128xf32>
    %7 = vector.shape_cast %6 : vector<1x8x128xf32> to vector<8x128xf32>
    %c1_7 = arith.constant 1 : index
    %c0_8 = arith.constant 0 : index
    %c0_9 = arith.constant 0 : index
    %8 = vector.load %arg2[%c1_7, %c0_8, %c0_9] : memref<9x8x1xf32, #tpu.memory_space<vmem>>, vector<1x8x1xf32>
    %9 = vector.shape_cast %8 : vector<1x8x1xf32> to vector<8x1xf32>
    %10 = vector.broadcast %9 : vector<8x1xf32> to vector<8x128xf32>
    %11 = arith.mulf %7, %10 : vector<8x128xf32>
    %12 = arith.addf %5, %11 : vector<8x128xf32>
    %c2 = arith.constant 2 : index
    %c0_10 = arith.constant 0 : index
    %c0_11 = arith.constant 0 : index
    %13 = vector.load %arg1[%c2, %c0_10, %c0_11] : memref<9x8x128xf32, #tpu.memory_space<vmem>>, vector<1x8x128xf32>
    %14 = vector.shape_cast %13 : vector<1x8x128xf32> to vector<8x128xf32>
    %c2_12 = arith.constant 2 : index
    %c0_13 = arith.constant 0 : index
    %c0_14 = arith.constant 0 : index
    %15 = vector.load %arg2[%c2_12, %c0_13, %c0_14] : memref<9x8x1xf32, #tpu.memory_space<vmem>>, vector<1x8x1xf32>
    %16 = vector.shape_cast %15 : vector<1x8x1xf32> to vector<8x1xf32>
    %17 = vector.broadcast %16 : vector<8x1xf32> to vector<8x128xf32>
    %18 = arith.mulf %14, %17 : vector<8x128xf32>
    %19 = arith.addf %12, %18 : vector<8x128xf32>
    %c3 = arith.constant 3 : index
    %c0_15 = arith.constant 0 : index
    %c0_16 = arith.constant 0 : index
    %20 = vector.load %arg1[%c3, %c0_15, %c0_16] : memref<9x8x128xf32, #tpu.memory_space<vmem>>, vector<1x8x128xf32>
    %21 = vector.shape_cast %20 : vector<1x8x128xf32> to vector<8x128xf32>
    %c3_17 = arith.constant 3 : index
    %c0_18 = arith.constant 0 : index
    %c0_19 = arith.constant 0 : index
    %22 = vector.load %arg2[%c3_17, %c0_18, %c0_19] : memref<9x8x1xf32, #tpu.memory_space<vmem>>, vector<1x8x1xf32>
    %23 = vector.shape_cast %22 : vector<1x8x1xf32> to vector<8x1xf32>
    %24 = vector.broadcast %23 : vector<8x1xf32> to vector<8x128xf32>
    %25 = arith.mulf %21, %24 : vector<8x128xf32>
    %26 = arith.addf %19, %25 : vector<8x128xf32>
    %c4 = arith.constant 4 : index
    %c0_20 = arith.constant 0 : index
    %c0_21 = arith.constant 0 : index
    %27 = vector.load %arg1[%c4, %c0_20, %c0_21] : memref<9x8x128xf32, #tpu.memory_space<vmem>>, vector<1x8x128xf32>
    %28 = vector.shape_cast %27 : vector<1x8x128xf32> to vector<8x128xf32>
    %c4_22 = arith.constant 4 : index
    %c0_23 = arith.constant 0 : index
    %c0_24 = arith.constant 0 : index
    %29 = vector.load %arg2[%c4_22, %c0_23, %c0_24] : memref<9x8x1xf32, #tpu.memory_space<vmem>>, vector<1x8x1xf32>
    %30 = vector.shape_cast %29 : vector<1x8x1xf32> to vector<8x1xf32>
    %31 = vector.broadcast %30 : vector<8x1xf32> to vector<8x128xf32>
    %32 = arith.mulf %28, %31 : vector<8x128xf32>
    %33 = arith.addf %26, %32 : vector<8x128xf32>
    %c5 = arith.constant 5 : index
    %c0_25 = arith.constant 0 : index
    %c0_26 = arith.constant 0 : index
    %34 = vector.load %arg1[%c5, %c0_25, %c0_26] : memref<9x8x128xf32, #tpu.memory_space<vmem>>, vector<1x8x128xf32>
    %35 = vector.shape_cast %34 : vector<1x8x128xf32> to vector<8x128xf32>
    %c5_27 = arith.constant 5 : index
    %c0_28 = arith.constant 0 : index
    %c0_29 = arith.constant 0 : index
    %36 = vector.load %arg2[%c5_27, %c0_28, %c0_29] : memref<9x8x1xf32, #tpu.memory_space<vmem>>, vector<1x8x1xf32>
    %37 = vector.shape_cast %36 : vector<1x8x1xf32> to vector<8x1xf32>
    %38 = vector.broadcast %37 : vector<8x1xf32> to vector<8x128xf32>
    %39 = arith.mulf %35, %38 : vector<8x128xf32>
    %40 = arith.addf %33, %39 : vector<8x128xf32>
    %c6 = arith.constant 6 : index
    %c0_30 = arith.constant 0 : index
    %c0_31 = arith.constant 0 : index
    %41 = vector.load %arg1[%c6, %c0_30, %c0_31] : memref<9x8x128xf32, #tpu.memory_space<vmem>>, vector<1x8x128xf32>
    %42 = vector.shape_cast %41 : vector<1x8x128xf32> to vector<8x128xf32>
    %c6_32 = arith.constant 6 : index
    %c0_33 = arith.constant 0 : index
    %c0_34 = arith.constant 0 : index
    %43 = vector.load %arg2[%c6_32, %c0_33, %c0_34] : memref<9x8x1xf32, #tpu.memory_space<vmem>>, vector<1x8x1xf32>
    %44 = vector.shape_cast %43 : vector<1x8x1xf32> to vector<8x1xf32>
    %45 = vector.broadcast %44 : vector<8x1xf32> to vector<8x128xf32>
    %46 = arith.mulf %42, %45 : vector<8x128xf32>
    %47 = arith.addf %40, %46 : vector<8x128xf32>
    %c7 = arith.constant 7 : index
    %c0_35 = arith.constant 0 : index
    %c0_36 = arith.constant 0 : index
    %48 = vector.load %arg1[%c7, %c0_35, %c0_36] : memref<9x8x128xf32, #tpu.memory_space<vmem>>, vector<1x8x128xf32>
    %49 = vector.shape_cast %48 : vector<1x8x128xf32> to vector<8x128xf32>
    %c7_37 = arith.constant 7 : index
    %c0_38 = arith.constant 0 : index
    %c0_39 = arith.constant 0 : index
    %50 = vector.load %arg2[%c7_37, %c0_38, %c0_39] : memref<9x8x1xf32, #tpu.memory_space<vmem>>, vector<1x8x1xf32>
    %51 = vector.shape_cast %50 : vector<1x8x1xf32> to vector<8x1xf32>
    %52 = vector.broadcast %51 : vector<8x1xf32> to vector<8x128xf32>
    %53 = arith.mulf %49, %52 : vector<8x128xf32>
    %54 = arith.addf %47, %53 : vector<8x128xf32>
    %c8 = arith.constant 8 : index
    %c0_40 = arith.constant 0 : index
    %c0_41 = arith.constant 0 : index
    %55 = vector.load %arg1[%c8, %c0_40, %c0_41] : memref<9x8x128xf32, #tpu.memory_space<vmem>>, vector<1x8x128xf32>
    %56 = vector.shape_cast %55 : vector<1x8x128xf32> to vector<8x128xf32>
    %c8_42 = arith.constant 8 : index
    %c0_43 = arith.constant 0 : index
    %c0_44 = arith.constant 0 : index
    %57 = vector.load %arg2[%c8_42, %c0_43, %c0_44] : memref<9x8x1xf32, #tpu.memory_space<vmem>>, vector<1x8x1xf32>
    %58 = vector.shape_cast %57 : vector<1x8x1xf32> to vector<8x1xf32>
    %59 = vector.broadcast %58 : vector<8x1xf32> to vector<8x128xf32>
    %60 = arith.mulf %56, %59 : vector<8x128xf32>
    %61 = arith.addf %54, %60 : vector<8x128xf32>
    %c0_45 = arith.constant 0 : index
    %c0_46 = arith.constant 0 : index
    %62 = vector.load %arg3[%c0_45, %c0_46] : memref<8x1xf32, #tpu.memory_space<vmem>>, vector<8x1xf32>
    %63 = vector.broadcast %62 : vector<8x1xf32> to vector<8x128xf32>
    %64 = arith.addf %61, %63 : vector<8x128xf32>
    %65 = arith.truncf %64 : vector<8x128xf32> to vector<8x128xbf16>
    %c0_47 = arith.constant 0 : index
    %c0_48 = arith.constant 0 : index
    %66 = vector.load %arg4[%c0_47, %c0_48] : memref<8x128xbf16, #tpu.memory_space<vmem>>, vector<8x128xbf16>
    tpu.vector_store %arg4[%c0_47, %c0_48], %65 {strides = array<i32>} : memref<8x128xbf16, #tpu.memory_space<vmem>>, vector<8x128xbf16>,
    %67 = tpu.iota {dimensions = array<i32: 1>} : vector<1x128xi32>
    %c128_i32 = arith.constant 128 : i32
    %68 = arith.muli %arg0, %c128_i32 : i32
    %c242_i32 = arith.constant 242 : i32
    %69 = arith.subi %c242_i32, %68 : i32
    %70 = vector.broadcast %69 : i32 to vector<1x128xi32>
    %71 = arith.cmpi slt, %67, %70 : vector<1x128xi32>
    %cst = arith.constant 0.000000e+00 : f32
    %72 = vector.shape_cast %71 : vector<1x128xi1> to vector<1x128xi1>
    %73 = vector.broadcast %72 : vector<1x128xi1> to vector<8x128xi1>
    %74 = vector.broadcast %cst : f32 to vector<8x128xf32>
    %75 = arith.select %73, %64, %74 : vector<8x128xi1>, vector<8x128xf32>
    %cst_49 = arith.constant dense<0.000000e+00> : vector<8xf32>
    %76 = vector.multi_reduction <add>, %75, %cst_49 [1] : vector<8x128xf32> to vector<8xf32>
    %77 = vector.shape_cast %76 : vector<8xf32> to vector<8x1xf32>
    %c0_50 = arith.constant 0 : index
    %c0_51 = arith.constant 0 : index
    %c0_52 = arith.constant 0 : index
    %78 = vector.load %arg5[%c0_50, %c0_51, %c0_52] : memref<1x16x1xf32, #tpu.memory_space<vmem>>, vector<1x8x1xf32>
    %79 = vector.shape_cast %78 : vector<1x8x1xf32> to vector<8x1xf32>
    %80 = vector.shape_cast %77 : vector<8x1xf32> to vector<1x8x1xf32>
    tpu.vector_store %arg5[%c0_50, %c0_51, %c0_52], %80 {strides = array<i32>} : memref<1x16x1xf32, #tpu.memory_space<vmem>>, vector<1x8x1xf32>,
    %81 = arith.mulf %75, %64 : vector<8x128xf32>
    %cst_53 = arith.constant dense<0.000000e+00> : vector<8xf32>
    %82 = vector.multi_reduction <add>, %81, %cst_53 [1] : vector<8x128xf32> to vector<8xf32>
    %83 = vector.shape_cast %82 : vector<8xf32> to vector<8x1xf32>
    %c0_54 = arith.constant 0 : index
    %c8_55 = arith.constant 8 : index
    %c0_56 = arith.constant 0 : index
    %84 = vector.load %arg5[%c0_54, %c8_55, %c0_56] : memref<1x16x1xf32, #tpu.memory_space<vmem>>, vector<1x8x1xf32>
    %85 = vector.shape_cast %84 : vector<1x8x1xf32> to vector<8x1xf32>
    %86 = vector.shape_cast %83 : vector<8x1xf32> to vector<1x8x1xf32>
    tpu.vector_store %arg5[%c0_54, %c8_55, %c0_56], %86 {strides = array<i32>} : memref<1x16x1xf32, #tpu.memory_space<vmem>>, vector<1x8x1xf32>,
    return
  }
  func.func @transform_0(%arg0: i32) -> (i32, i32, i32) {
    %c0_i32 = arith.constant 0 : i32
    %c0_i32_0 = arith.constant 0 : i32
    %c0_i32_1 = arith.constant 0 : i32
    return %c0_i32, %c0_i32_0, %arg0 : i32, i32, i32
  }
  func.func @transform_1(%arg0: i32) -> (i32, i32, i32) {
    %c0_i32 = arith.constant 0 : i32
    %c0_i32_0 = arith.constant 0 : i32
    %c0_i32_1 = arith.constant 0 : i32
    %c0_i32_2 = arith.constant 0 : i32
    return %c0_i32, %c0_i32_0, %c0_i32_1 : i32, i32, i32
  }
  func.func @transform_2(%arg0: i32) -> (i32, i32) {
    %c0_i32 = arith.constant 0 : i32
    %c0_i32_0 = arith.constant 0 : i32
    %c0_i32_1 = arith.constant 0 : i32
    return %c0_i32, %c0_i32_0 : i32, i32
  }
  func.func @transform_3(%arg0: i32) -> (i32, i32) {
    %c0_i32 = arith.constant 0 : i32
    %c0_i32_0 = arith.constant 0 : i32
    return %c0_i32, %arg0 : i32, i32
  }
  func.func @transform_4(%arg0: i32) -> (i32, i32, i32) {
    %c0_i32 = arith.constant 0 : i32
    %c0_i32_0 = arith.constant 0 : i32
    %c0_i32_1 = arith.constant 0 : i32
    return %arg0, %c0_i32, %c0_i32_0 : i32, i32, i32
  }
}

module attributes {stable_mosaic.version = 11 : i64} {
  func.func @_pw_bn2_stats_kernel(%arg0: i32, %arg1: memref<8x128xbf16, #tpu.memory_space<vmem>>, %arg2: memref<8x1xf32, #tpu.memory_space<vmem>>, %arg3: memref<8x1xf32, #tpu.memory_space<vmem>>, %arg4: memref<16x8xf32, #tpu.memory_space<vmem>>, %arg5: memref<16x1xf32, #tpu.memory_space<vmem>>, %arg6: memref<16x128xbf16, #tpu.memory_space<vmem>>, %arg7: memref<1x32x1xf32, #tpu.memory_space<vmem>>) attributes {dimension_semantics = [#tpu.dimension_semantics<parallel>], iteration_bounds = array<i64: 2>, scalar_prefetch = 0 : i64, scratch_operands = 0 : i64, tpu.core_type = #tpu.core_type<tc>, window_params = [{transform_indices = @transform_0, window_bounds = array<i64: 8, 128>}, {pipeline_mode = #tpu.pipeline_mode<synchronous>, transform_indices = @transform_1, window_bounds = array<i64: 8, 1>}, {pipeline_mode = #tpu.pipeline_mode<synchronous>, transform_indices = @transform_2, window_bounds = array<i64: 8, 1>}, {pipeline_mode = #tpu.pipeline_mode<synchronous>, transform_indices = @transform_3, window_bounds = array<i64: 16, 8>}, {pipeline_mode = #tpu.pipeline_mode<synchronous>, transform_indices = @transform_4, window_bounds = array<i64: 16, 1>}, {transform_indices = @transform_5, window_bounds = array<i64: 16, 128>}, {transform_indices = @transform_6, window_bounds = array<i64: 1, 32, 1>}]} {
    %c0 = arith.constant 0 : index
    %c0_0 = arith.constant 0 : index
    %0 = vector.load %arg1[%c0, %c0_0] : memref<8x128xbf16, #tpu.memory_space<vmem>>, vector<8x128xbf16>
    %1 = arith.extf %0 : vector<8x128xbf16> to vector<8x128xf32>
    %c0_1 = arith.constant 0 : index
    %c0_2 = arith.constant 0 : index
    %2 = vector.load %arg2[%c0_1, %c0_2] : memref<8x1xf32, #tpu.memory_space<vmem>>, vector<8x1xf32>
    %3 = vector.broadcast %2 : vector<8x1xf32> to vector<8x128xf32>
    %4 = arith.mulf %1, %3 : vector<8x128xf32>
    %c0_3 = arith.constant 0 : index
    %c0_4 = arith.constant 0 : index
    %5 = vector.load %arg3[%c0_3, %c0_4] : memref<8x1xf32, #tpu.memory_space<vmem>>, vector<8x1xf32>
    %6 = vector.broadcast %5 : vector<8x1xf32> to vector<8x128xf32>
    %7 = arith.addf %4, %6 : vector<8x128xf32>
    %cst = arith.constant 1.000000e-01 : f32
    %8 = vector.broadcast %cst : f32 to vector<8x128xf32>
    %9 = arith.mulf %8, %7 : vector<8x128xf32>
    %10 = arith.maximumf %7, %9 : vector<8x128xf32>
    %c0_5 = arith.constant 0 : index
    %c0_6 = arith.constant 0 : index
    %11 = vector.load %arg4[%c0_5, %c0_6] : memref<16x8xf32, #tpu.memory_space<vmem>>, vector<16x8xf32>
    %12 = vector.extract_strided_slice %11 {offsets = [0, 0], sizes = [16, 1], strides = [1, 1]} : vector<16x8xf32> to vector<16x1xf32>
    %13 = vector.extract_strided_slice %10 {offsets = [0, 0], sizes = [1, 128], strides = [1, 1]} : vector<8x128xf32> to vector<1x128xf32>
    %14 = vector.broadcast %12 : vector<16x1xf32> to vector<16x128xf32>
    %15 = vector.broadcast %13 : vector<1x128xf32> to vector<16x128xf32>
    %16 = arith.mulf %14, %15 : vector<16x128xf32>
    %17 = vector.extract_strided_slice %11 {offsets = [0, 1], sizes = [16, 1], strides = [1, 1]} : vector<16x8xf32> to vector<16x1xf32>
    %18 = vector.extract_strided_slice %10 {offsets = [1, 0], sizes = [1, 128], strides = [1, 1]} : vector<8x128xf32> to vector<1x128xf32>
    %19 = vector.broadcast %17 : vector<16x1xf32> to vector<16x128xf32>
    %20 = vector.broadcast %18 : vector<1x128xf32> to vector<16x128xf32>
    %21 = arith.mulf %19, %20 : vector<16x128xf32>
    %22 = arith.addf %16, %21 : vector<16x128xf32>
    %23 = vector.extract_strided_slice %11 {offsets = [0, 2], sizes = [16, 1], strides = [1, 1]} : vector<16x8xf32> to vector<16x1xf32>
    %24 = vector.extract_strided_slice %10 {offsets = [2, 0], sizes = [1, 128], strides = [1, 1]} : vector<8x128xf32> to vector<1x128xf32>
    %25 = vector.broadcast %23 : vector<16x1xf32> to vector<16x128xf32>
    %26 = vector.broadcast %24 : vector<1x128xf32> to vector<16x128xf32>
    %27 = arith.mulf %25, %26 : vector<16x128xf32>
    %28 = arith.addf %22, %27 : vector<16x128xf32>
    %29 = vector.extract_strided_slice %11 {offsets = [0, 3], sizes = [16, 1], strides = [1, 1]} : vector<16x8xf32> to vector<16x1xf32>
    %30 = vector.extract_strided_slice %10 {offsets = [3, 0], sizes = [1, 128], strides = [1, 1]} : vector<8x128xf32> to vector<1x128xf32>
    %31 = vector.broadcast %29 : vector<16x1xf32> to vector<16x128xf32>
    %32 = vector.broadcast %30 : vector<1x128xf32> to vector<16x128xf32>
    %33 = arith.mulf %31, %32 : vector<16x128xf32>
    %34 = arith.addf %28, %33 : vector<16x128xf32>
    %35 = vector.extract_strided_slice %11 {offsets = [0, 4], sizes = [16, 1], strides = [1, 1]} : vector<16x8xf32> to vector<16x1xf32>
    %36 = vector.extract_strided_slice %10 {offsets = [4, 0], sizes = [1, 128], strides = [1, 1]} : vector<8x128xf32> to vector<1x128xf32>
    %37 = vector.broadcast %35 : vector<16x1xf32> to vector<16x128xf32>
    %38 = vector.broadcast %36 : vector<1x128xf32> to vector<16x128xf32>
    %39 = arith.mulf %37, %38 : vector<16x128xf32>
    %40 = arith.addf %34, %39 : vector<16x128xf32>
    %41 = vector.extract_strided_slice %11 {offsets = [0, 5], sizes = [16, 1], strides = [1, 1]} : vector<16x8xf32> to vector<16x1xf32>
    %42 = vector.extract_strided_slice %10 {offsets = [5, 0], sizes = [1, 128], strides = [1, 1]} : vector<8x128xf32> to vector<1x128xf32>
    %43 = vector.broadcast %41 : vector<16x1xf32> to vector<16x128xf32>
    %44 = vector.broadcast %42 : vector<1x128xf32> to vector<16x128xf32>
    %45 = arith.mulf %43, %44 : vector<16x128xf32>
    %46 = arith.addf %40, %45 : vector<16x128xf32>
    %47 = vector.extract_strided_slice %11 {offsets = [0, 6], sizes = [16, 1], strides = [1, 1]} : vector<16x8xf32> to vector<16x1xf32>
    %48 = vector.extract_strided_slice %10 {offsets = [6, 0], sizes = [1, 128], strides = [1, 1]} : vector<8x128xf32> to vector<1x128xf32>
    %49 = vector.broadcast %47 : vector<16x1xf32> to vector<16x128xf32>
    %50 = vector.broadcast %48 : vector<1x128xf32> to vector<16x128xf32>
    %51 = arith.mulf %49, %50 : vector<16x128xf32>
    %52 = arith.addf %46, %51 : vector<16x128xf32>
    %53 = vector.extract_strided_slice %11 {offsets = [0, 7], sizes = [16, 1], strides = [1, 1]} : vector<16x8xf32> to vector<16x1xf32>
    %54 = vector.extract_strided_slice %10 {offsets = [7, 0], sizes = [1, 128], strides = [1, 1]} : vector<8x128xf32> to vector<1x128xf32>
    %55 = vector.broadcast %53 : vector<16x1xf32> to vector<16x128xf32>
    %56 = vector.broadcast %54 : vector<1x128xf32> to vector<16x128xf32>
    %57 = arith.mulf %55, %56 : vector<16x128xf32>
    %58 = arith.addf %52, %57 : vector<16x128xf32>
    %c0_7 = arith.constant 0 : index
    %c0_8 = arith.constant 0 : index
    %59 = vector.load %arg5[%c0_7, %c0_8] : memref<16x1xf32, #tpu.memory_space<vmem>>, vector<16x1xf32>
    %60 = vector.broadcast %59 : vector<16x1xf32> to vector<16x128xf32>
    %61 = arith.addf %58, %60 : vector<16x128xf32>
    %62 = arith.truncf %61 : vector<16x128xf32> to vector<16x128xbf16>
    %c0_9 = arith.constant 0 : index
    %c0_10 = arith.constant 0 : index
    %63 = vector.load %arg6[%c0_9, %c0_10] : memref<16x128xbf16, #tpu.memory_space<vmem>>, vector<16x128xbf16>
    tpu.vector_store %arg6[%c0_9, %c0_10], %62 {strides = array<i32>} : memref<16x128xbf16, #tpu.memory_space<vmem>>, vector<16x128xbf16>,
    %64 = tpu.iota {dimensions = array<i32: 1>} : vector<1x128xi32>
    %c128_i32 = arith.constant 128 : i32
    %65 = arith.muli %arg0, %c128_i32 : i32
    %c242_i32 = arith.constant 242 : i32
    %66 = arith.subi %c242_i32, %65 : i32
    %67 = vector.broadcast %66 : i32 to vector<1x128xi32>
    %68 = arith.cmpi slt, %64, %67 : vector<1x128xi32>
    %cst_11 = arith.constant 0.000000e+00 : f32
    %69 = vector.shape_cast %68 : vector<1x128xi1> to vector<1x128xi1>
    %70 = vector.broadcast %69 : vector<1x128xi1> to vector<16x128xi1>
    %71 = vector.broadcast %cst_11 : f32 to vector<16x128xf32>
    %72 = arith.select %70, %61, %71 : vector<16x128xi1>, vector<16x128xf32>
    %cst_12 = arith.constant dense<0.000000e+00> : vector<16xf32>
    %73 = vector.multi_reduction <add>, %72, %cst_12 [1] : vector<16x128xf32> to vector<16xf32>
    %74 = vector.shape_cast %73 : vector<16xf32> to vector<16x1xf32>
    %c0_13 = arith.constant 0 : index
    %c0_14 = arith.constant 0 : index
    %c0_15 = arith.constant 0 : index
    %75 = vector.load %arg7[%c0_13, %c0_14, %c0_15] : memref<1x32x1xf32, #tpu.memory_space<vmem>>, vector<1x16x1xf32>
    %76 = vector.shape_cast %75 : vector<1x16x1xf32> to vector<16x1xf32>
    %77 = vector.shape_cast %74 : vector<16x1xf32> to vector<1x16x1xf32>
    tpu.vector_store %arg7[%c0_13, %c0_14, %c0_15], %77 {strides = array<i32>} : memref<1x32x1xf32, #tpu.memory_space<vmem>>, vector<1x16x1xf32>,
    %78 = arith.mulf %72, %61 : vector<16x128xf32>
    %cst_16 = arith.constant dense<0.000000e+00> : vector<16xf32>
    %79 = vector.multi_reduction <add>, %78, %cst_16 [1] : vector<16x128xf32> to vector<16xf32>
    %80 = vector.shape_cast %79 : vector<16xf32> to vector<16x1xf32>
    %c0_17 = arith.constant 0 : index
    %c16 = arith.constant 16 : index
    %c0_18 = arith.constant 0 : index
    %81 = vector.load %arg7[%c0_17, %c16, %c0_18] : memref<1x32x1xf32, #tpu.memory_space<vmem>>, vector<1x16x1xf32>
    %82 = vector.shape_cast %81 : vector<1x16x1xf32> to vector<16x1xf32>
    %83 = vector.shape_cast %80 : vector<16x1xf32> to vector<1x16x1xf32>
    tpu.vector_store %arg7[%c0_17, %c16, %c0_18], %83 {strides = array<i32>} : memref<1x32x1xf32, #tpu.memory_space<vmem>>, vector<1x16x1xf32>,
    return
  }
  func.func @transform_0(%arg0: i32) -> (i32, i32) {
    %c0_i32 = arith.constant 0 : i32
    %c0_i32_0 = arith.constant 0 : i32
    return %c0_i32, %arg0 : i32, i32
  }
  func.func @transform_1(%arg0: i32) -> (i32, i32) {
    %c0_i32 = arith.constant 0 : i32
    %c0_i32_0 = arith.constant 0 : i32
    %c0_i32_1 = arith.constant 0 : i32
    return %c0_i32, %c0_i32_0 : i32, i32
  }
  func.func @transform_2(%arg0: i32) -> (i32, i32) {
    %c0_i32 = arith.constant 0 : i32
    %c0_i32_0 = arith.constant 0 : i32
    %c0_i32_1 = arith.constant 0 : i32
    return %c0_i32, %c0_i32_0 : i32, i32
  }
  func.func @transform_3(%arg0: i32) -> (i32, i32) {
    %c0_i32 = arith.constant 0 : i32
    %c0_i32_0 = arith.constant 0 : i32
    %c0_i32_1 = arith.constant 0 : i32
    return %c0_i32, %c0_i32_0 : i32, i32
  }
  func.func @transform_4(%arg0: i32) -> (i32, i32) {
    %c0_i32 = arith.constant 0 : i32
    %c0_i32_0 = arith.constant 0 : i32
    %c0_i32_1 = arith.constant 0 : i32
    return %c0_i32, %c0_i32_0 : i32, i32
  }
  func.func @transform_5(%arg0: i32) -> (i32, i32) {
    %c0_i32 = arith.constant 0 : i32
    %c0_i32_0 = arith.constant 0 : i32
    return %c0_i32, %arg0 : i32, i32
  }
  func.func @transform_6(%arg0: i32) -> (i32, i32, i32) {
    %c0_i32 = arith.constant 0 : i32
    %c0_i32_0 = arith.constant 0 : i32
    %c0_i32_1 = arith.constant 0 : i32
    return %arg0, %c0_i32, %c0_i32_0 : i32, i32, i32
  }
}

</mosaic_0001>

<bundles_post_ra>
// kernel: depthwise_separable_conv3.2
= control target key start
LH: loop header
LB: loop body
LE: loop exit
PB: predicated region body
PF: predicated region fallthrough
CT: control target
= control target key end

     0   :  { %s599_s15 = smov 0   ;;  %s601_s16 = smov 0   ;;  %s687_s0 = inlined_call_operand.vmem [shape: f32[9,8,256], index: 0, kind: input, shape index: {}]   ;;  %s688_s1 = inlined_call_operand.vmem [shape: f32[9,8,1], index: 1, kind: input, shape index: {}]   ;;  %s689_s2 = inlined_call_operand.vmem [shape: f32[8,1], index: 2, kind: input, shape index: {}]   ;;  %s690_s3 = inlined_call_operand.vmem [shape: bf16[8,256], index: 3, kind: output, shape index: {0}]   ;;  %s691_s4 = inlined_call_operand.vmem [shape: f32[2,16,1], index: 4, kind: output, shape index: {1}]  }
   0x1   :  { %s603_s17 = smov 0  }
   0x2 LB: > { %s615_s18 = sadd.s32 4294967295, %s571_s17   ;;  %s618_s19 = sadd.s32 1, %s571_s17   ;;  %s571_s17 = sphi %s603_s17, %s694_s17   ;;  %s567_s16 = sphi %s601_s16, %s693_s16   ;;  %s563_s15 = sphi %s599_s15, %s692_s15  }
   0x3   : > { %s19_s20 = ssub.s32 %s571_s17, %s618_s19  ;;  %s22_s21 = sadd.s32 1, %s567_s16 }
   0x4   : > { %p20_p0 = scmp.eq.s32.totalorder %s19_s20, 0  ;;  %p29_p1 = scmp.ne.s32.totalorder %s567_s16, %s563_s15 }
   0x5   : > { %p30_p2 = scmp.eq.s32.totalorder %s571_s17, 0  ;;  %p493_p4 = scmp.ge.s32.totalorder %s571_s17, 2 }
   0x6   : > { %s627_s22 = scalar_select %p20_p0, %s567_s16, %s22_s21  }
   0x7   : > { %p31_p3 = por %p30_p2, %p29_p1  ;;  %155 = sbr.rel (%p493_p4) target bundleno = 25 (0x19), region = 24 }
   0xc   : > { %158 = sbr.rel (!%p31_p3) target bundleno = 25 (0x19), region = 28  ;;  %s160_s23 = sand.u32 (%p31_p3), 1, %s567_s16  }
   0xd   : > { %s494_s24 = sshll.u32 (%p31_p3), %s571_s17, 3  ;;  %s519_s25 = smul.u32 (%p31_p3), 72, %s160_s23 }
   0xe   : > { %s164_s28 = scalar_lea.vmem (%p31_p3), %s687_s0, %s494_s24 }
   0xf   : > { %v209_v0 = vld [vmem:[%s164_s28] sm:$0xff] (%p31_p3)  ;;  %v211_v1 = vld [vmem:[%s164_s28 + $0x10] sm:$0xff] (%p31_p3)  ;;  %s162_s29 = scalar_lea.vmem (%p31_p3), [#allocation2], %s519_s25 }
  0x10   : > { %v213_v2 = vld [vmem:[%s164_s28 + $0x20] sm:$0xff] (%p31_p3)  ;;  %210 = vst [vmem:[%s162_s29] sm:$0xff] (%p31_p3), %v209_v0  ;;  %v215_v3 = vld [vmem:[%s164_s28 + $0x30] sm:$0xff] (%p31_p3) }
  0x11   : > { %212 = vst [vmem:[%s162_s29 + $0x8] sm:$0xff] %v211_v1  ;;  %v217_v4 = vld [vmem:[%s164_s28 + $0x40] sm:$0xff]  ;;  %v219_v5 = vld [vmem:[%s164_s28 + $0x50] sm:$0xff] }
  0x12   : > { %214 = vst [vmem:[%s162_s29 + $0x10] sm:$0xff] %v213_v2  ;;  %v221_v6 = vld [vmem:[%s164_s28 + $0x60] sm:$0xff]  ;;  %v223_v7 = vld [vmem:[%s164_s28 + $0x70] sm:$0xff] }
  0x13   : > { %216 = vst [vmem:[%s162_s29 + $0x18] sm:$0xff] %v215_v3  ;;  %v225_v8 = vld [vmem:[%s164_s28 + $0x80] sm:$0xff] }
  0x14   : > { %218 = vst [vmem:[%s162_s29 + $0x20] sm:$0xff] %v217_v4 }
  0x15   : > { %220 = vst [vmem:[%s162_s29 + $0x28] sm:$0xff] %v219_v5 }
  0x16   : > { %222 = vst [vmem:[%s162_s29 + $0x30] sm:$0xff] %v221_v6 }
  0x17   : > { %224 = vst [vmem:[%s162_s29 + $0x38] sm:$0xff] %v223_v7 }
  0x18   : > { %226 = vst [vmem:[%s162_s29 + $0x40] sm:$0xff] %v225_v8 }
  0x19 PF: > { %p495_p5 = scmp.ge.s32.totalorder %s571_s17, 1  ;;  %p231_p6 = scmp.lt.s32.totalorder %s571_s17, 3 }
  0x1b   : > { %p232_p7 = pnand %p495_p5, %p231_p6 }
  0x1c   : > { %s238_s29 = sand.u32 (!%p232_p7), 1, %s563_s15   ;;  %s515_s15 = sshll.u32 (!%p232_p7), %s615_s18, 7 }
  0x1d   : > { %235 = sbr.rel (%p232_p7) target bundleno = 299 (0x12b), region = 66  ;;  %p267_p8 = scmp.lt.s32.totalorder (!%p232_p7), %s615_s18, 1 }
  0x1e   : > { %s520_s30 = smul.u32 (!%p232_p7), 72, %s238_s29  ;;  %s384_s6 = ssub.s32 (!%p232_p7), 242, %s515_s15 }
  0x20   : > { %s240_s5 = scalar_lea.vmem (!%p232_p7), [#allocation2], %s520_s30 }
  0x22   : > { %v502_v9 = vld [vmem:[%s688_s1 + $0x10] sm:$0xff]  ;;  %v277_v10 = vld [vmem:[%s688_s1] sm:$0xff]  ;;  %v573_v11 = vmov 0   ;;  %v504_v13 = vld [vmem:[%s688_s1 + $0x18] sm:$0xff]  ;;  %v381_v46 = vlaneseq  ;;  %s696_s18 = smov (!%p267_p8, %s615_s18), 1  ;;  %v385_v56 = vstv %s384_s6  ;;  %vm392_vm1 = vcmask 7168  }
  0x23   : > { %547 = vset.pattern.permute.xlu1 %v573_v11  ;;  %546 = vset.pattern.permute.xlu0 %v573_v11  ;;  %v506_v12 = vld [vmem:[%s688_s1 + $0x20] sm:$0xff]  ;;  %v500_v14 = vld [vmem:[%s688_s1 + $0x8] sm:$0xff]  ;;  %v512_v16 = vld [vmem:[%s688_s1 + $0x38] sm:$0xff]  ;;  %s496_s7 = sshll.u32 %s696_s18, 2  ;;  %s518_s11 = sshll.u32 %s696_s18, 4 }
  0x24   : > { %301 = vperm.xlu1 %547, %v502_v9   ;;  %280 = vperm.xlu0 %546, %v277_v10   ;;  %v508_v15 = vld [vmem:[%s688_s1 + $0x28] sm:$0xff]  ;;  %v510_v17 = vld [vmem:[%s688_s1 + $0x30] sm:$0xff]  ;;  %v514_v18 = vld [vmem:[%s688_s1 + $0x40] sm:$0xff]  ;;  %v382_v53 = vand.u32 127, %v381_v46  ;;  %s270_s10 = scalar_lea.vmem %s690_s3, %s496_s7  ;;  %s275_s14 = scalar_lea.vmem %s691_s4, %s518_s11 }
  0x25   : > { %548 = vset.pattern.permute.xlu2 %v573_v11  ;;  %v372_v19 = vld [vmem:[%s689_s2] sm:$0xff]  ;;  %v499_v24 = vld [vmem:[%s240_s5 + $0x8] sm:$0xff]  ;;  %v501_v25 = vld [vmem:[%s240_s5 + $0x10] sm:$0xff] }
  0x26   : > { %323 = vperm.xlu2 %548, %v506_v12   ;;  %v276_v23 = vld [vmem:[%s240_s5] sm:$0xff]  ;;  %v503_v31 = vld [vmem:[%s240_s5 + $0x18] sm:$0xff]  ;;  %v507_v37 = vld [vmem:[%s240_s5 + $0x28] sm:$0xff]  ;;  %vm386_vm0 = vcmp.lt.s32.totalorder %v382_v53, %v385_v56 }
  0x27   : > { %v505_v34 = vld [vmem:[%s240_s5 + $0x20] sm:$0xff]  ;;  %v509_v41 = vld [vmem:[%s240_s5 + $0x30] sm:$0xff]  ;;  %v511_v45 = vld [vmem:[%s240_s5 + $0x38] sm:$0xff] }
  0x28   : > { %v513_v50 = vld [vmem:[%s240_s5 + $0x40] sm:$0xff] }
  0x2c   : > { %312 = vperm.xlu1 %547, %v504_v13   ;;  %290 = vperm.xlu0 %546, %v500_v14  }
  0x2e   : > { %334 = vperm.xlu2 %548, %v508_v15  }
  0x34   : > { %356 = vperm.xlu1 %547, %v512_v16   ;;  %345 = vperm.xlu0 %546, %v510_v17  }
  0x36   : > { %367 = vperm.xlu2 %548, %v514_v18  }
  0x3c   : > { %375 = vperm.xlu0 %546, %v372_v19  }
  0x80   : > { %v324_v20 = vpop.permute.xlu2 %323 }
  0x81   : > { %v326_v38 = vmul.f32 %v505_v34, %v324_v20 }
  0x88   : > { %v335_v30 = vpop.permute.xlu2 %334 }
  0x89   : > { %v337_v42 = vmul.f32 %v507_v37, %v335_v30 }
  0x90   : > { %v368_v49 = vpop.permute.xlu2 %367 }
  0x91   : > { %v370_v54 = vmul.f32 %v513_v50, %v368_v49 }
  0x96   : > { %v302_v21 = vpop.permute.xlu1 %301  ;;  %v281_v22 = vpop.permute.xlu0 %280 }
  0x97   : > { %v283_v28 = vmul.f32 %v281_v22, %v276_v23  ;;  %v304_v32 = vmul.f32 %v501_v25, %v302_v21 }
  0x9e   : > { %v313_v26 = vpop.permute.xlu1 %312  ;;  %v291_v27 = vpop.permute.xlu0 %290 }
  0x9f   : > { %v293_v29 = vmul.f32 %v499_v24, %v291_v27  ;;  %v315_v35 = vmul.f32 %v503_v31, %v313_v26 }
  0xa1   : > { %v294_v33 = vadd.f32 %v293_v29, %v283_v28 }
  0xa3   : > { %v305_v36 = vadd.f32 %v304_v32, %v294_v33 }
  0xa5   : > { %v316_v39 = vadd.f32 %v315_v35, %v305_v36 }
  0xa6   : > { %v346_v40 = vpop.permute.xlu0 %345  ;;  %v357_v44 = vpop.permute.xlu1 %356 }
  0xa7   : > { %v327_v43 = vadd.f32 %v326_v38, %v316_v39  ;;  %v348_v48 = vmul.f32 %v509_v41, %v346_v40  ;;  %v359_v51 = vmul.f32 %v511_v45, %v357_v44 }
  0xa9   : > { %v338_v47 = vadd.f32 %v337_v42, %v327_v43 }
  0xab   : > { %v349_v52 = vadd.f32 %v348_v48, %v338_v47 }
  0xad   : > { %v360_v55 = vadd.f32 %v359_v51, %v349_v52 }
  0xae   : > { %v376_v58 = vpop.permute.xlu0 %375 }
  0xaf   : > { %v371_v57 = vadd.f32 %v370_v54, %v360_v55 }
  0xb1   : > { %v378_v59 = vadd.f32 %v376_v58, %v371_v57 }
  0xb3   : > { %v379_v60 = vpack.c.bf16 %v378_v59, %v378_v59  ;;  %v389_v61 = vsel %vm386_vm0, %v378_v59, 0.0 }
  0xb4   : > { %390 = vadd.xlane.f32.xlu1 %v389_v61  ;;  %v394_v62 = vmul.f32 %v389_v61, %v378_v59 }
  0xb5   : > { %380 = vst [vmem:[%s270_s10] sm:$0xf] %v379_v60 }
  0xb6   : > { %395 = vadd.xlane.f32.xlu2 %v394_v62 }
 0x127   : > { %v391_v63 = vpop.xlane.xlu1 %390 }
 0x128   : > { %393 = vst.msk [vmem:[%s275_s14] sm:$0xff] %vm392_vm1, %v391_v63 }
 0x129   : > { %v396_v0 = vpop.xlane.xlu2 %395 }
 0x12a   : > { %397 = vst.msk [vmem:[%s275_s14 + $0x8] sm:$0xff] %vm392_vm1, %v396_v0 }
 0x12b PF: > { %p12_p9 = scmp.ge.s32.totalorder %s618_s19, 4   ;;  %s692_s15 = smov %s567_s16 }
 0x12c   : > { %s693_s16 = smov %s627_s22  ;;  %s694_s17 = smov %s618_s19 }
 0x12d   :  { %14 = sbr.rel (!%p12_p9) target bundleno = 2 (0x2), region = 133 }

// kernel: depthwise_separable_conv3.3
= control target key start
LH: loop header
LB: loop body
LE: loop exit
PB: predicated region body
PF: predicated region fallthrough
CT: control target
= control target key end

     0   :  { %s697_s21 = smov 0   ;;  %s699_s22 = smov 0   ;;  %s782_s0 = inlined_call_operand.vmem [shape: bf16[8,256], index: 0, kind: input, shape index: {}]   ;;  %s783_s1 = inlined_call_operand.vmem [shape: f32[8,1], index: 1, kind: input, shape index: {}]   ;;  %s784_s2 = inlined_call_operand.vmem [shape: f32[8,1], index: 2, kind: input, shape index: {}]   ;;  %s785_s3 = inlined_call_operand.vmem [shape: f32[16,8], index: 3, kind: input, shape index: {}]   ;;  %s786_s4 = inlined_call_operand.vmem [shape: f32[16,1], index: 4, kind: input, shape index: {}]   ;;  %s787_s5 = inlined_call_operand.vmem [shape: bf16[16,256], index: 5, kind: output, shape index: {0}]   ;;  %s788_s6 = inlined_call_operand.vmem [shape: f32[2,32,1], index: 6, kind: output, shape index: {1}]  }
   0x1   :  { %s701_s23 = smov 0  }
   0x2 LB: > { %s710_s24 = sadd.s32 4294967295, %s652_s23   ;;  %s712_s25 = sadd.s32 1, %s652_s23   ;;  %s652_s23 = sphi %s701_s23, %s794_s23   ;;  %s648_s22 = sphi %s699_s22, %s793_s22   ;;  %s644_s21 = sphi %s697_s21, %s792_s21  }
   0x3   : > { %s131_s26 = ssub.s32 %s652_s23, %s712_s25  ;;  %s134_s27 = sadd.s32 1, %s648_s22 }
   0x4   : > { %p132_p0 = scmp.eq.s32.totalorder %s131_s26, 0  ;;  %p144_p1 = scmp.ne.s32.totalorder %s648_s22, %s644_s21 }
   0x5   : > { %p145_p2 = scmp.eq.s32.totalorder %s710_s24, 1  ;;  %p564_p3 = scmp.ge.s32.totalorder %s652_s23, 1 }
   0x6   : > { %s720_s28 = scalar_select %p132_p0, %s648_s22, %s134_s27  }
   0x7   : > { %p722_p4 = por %p145_p2, %p144_p1  ;;  %p214_p5 = scmp.lt.s32.totalorder %s652_s23, 3 }
   0x9   : > { %p215_p6 = pnand %p564_p3, %p214_p5 }
   0xa   : > { %p247_p7 = scmp.lt.s32.totalorder (!%p215_p6), %s710_s24, 1  ;;  %s569_s27 = sshll.u32 (!%p215_p6), %s710_s24, 7 }
   0xb   : > { %218 = sbr.rel (%p215_p6) target bundleno = 317 (0x13d), region = 40  ;;  %s401_s30 = ssub.s32 (!%p215_p6), 242, %s569_s27 }
   0xc   : > { %s237_s7 = sand.u32 (!%p215_p6), 1, %s644_s21  }
   0xd   : > { %s565_s8 = sshll.u32 (!%p215_p6), %s237_s7, 3 }
   0xe   : > { %s239_s9 = scalar_lea.vmem (!%p215_p6), [#allocation2], %s565_s8 }
  0x10   : > { %v274_v0 = vld [vmem:[%s785_s3] sm:$0xff]  ;;  %v654_v2 = vmov 0   ;;  %v655_v3 = vmov 1   ;;  %v275_v4 = vld [vmem:[%s785_s3 + $0x8] sm:$0xff]  ;;  %v656_v6 = vmov 2   ;;  %v657_v7 = vmov 3  }
  0x11   : > { %v258_v1 = vld [vmem:[%s783_s1] sm:$0xff]  ;;  %613 = vset.pattern.permute.xlu1 %v654_v2  ;;  %612 = vset.pattern.permute.xlu0 %v654_v2  ;;  %v658_v8 = vmov 4   ;;  %v659_v9 = vmov 5   ;;  %v660_v10 = vmov 7   ;;  %v661_v11 = vmov 6   ;;  %v381_v13 = vld [vmem:[%s786_s4 + $0x8] sm:$0xff] }
  0x12   : > { %278 = vperm.xlu1 %613, %v274_v0   ;;  %261 = vperm.xlu0 %612, %v258_v1   ;;  %v265_v5 = vld [vmem:[%s784_s2] sm:$0xff]  ;;  %s746_s18 = scalar_select %p247_p7, %s710_s24, 1  ;;  %v398_v54 = vlaneseq  ;;  %vm412_vm1 = vcmask 7168  }
  0x13   : > { %614 = vset.pattern.permute.xlu2 %v655_v3  ;;  %v380_v12 = vld [vmem:[%s786_s4] sm:$0xff]  ;;  %s571_s21 = sshll.u32 (%p722_p4), %s710_s24, 2 }
  0x14   : > { %290 = vperm.xlu2 %614, %v274_v0   ;;  %s566_s19 = sshll.u32 %s746_s18, 2  ;;  %s574_s10 = sshll.u32 %s746_s18, 5 }
  0x15   : > { %s250_s26 = scalar_lea.vmem %s782_s0, %s566_s19  ;;  %s255_s13 = scalar_lea.vmem %s788_s6, %s574_s10 }
  0x16   : > { %v256_v18 = vld [vmem:[%s250_s26] sm:$0xf]  ;;  %s436_s16 = scalar_lea.vmem (%p722_p4), %s787_s5, %s571_s21 }
  0x17   : > { %v257_v19 = vunpack.c.l.bf16 %v256_v18 }
  0x1a   : > { %283 = vperm.xlu1 %613, %v275_v4   ;;  %268 = vperm.xlu0 %612, %v265_v5  }
  0x1c   : > { %294 = vperm.xlu2 %614, %v275_v4  }
  0x22   : > { %616 = vset.pattern.permute.xlu1 %v656_v6  ;;  %615 = vset.pattern.permute.xlu0 %v656_v6 }
  0x23   : > { %307 = vperm.xlu1 %616, %v275_v4   ;;  %303 = vperm.xlu0 %615, %v274_v0  }
  0x24   : > { %617 = vset.pattern.permute.xlu2 %v657_v7 }
  0x25   : > { %316 = vperm.xlu2 %617, %v274_v0  }
  0x2b   : > { %618 = vset.pattern.permute.xlu1 %v657_v7  ;;  %620 = vset.pattern.permute.xlu0 %v658_v8 }
  0x2c   : > { %320 = vperm.xlu1 %618, %v275_v4   ;;  %333 = vperm.xlu0 %620, %v275_v4  }
  0x2d   : > { %619 = vset.pattern.permute.xlu2 %v658_v8 }
  0x2e   : > { %329 = vperm.xlu2 %619, %v274_v0  }
  0x34   : > { %621 = vset.pattern.permute.xlu1 %v659_v9  ;;  %625 = vset.pattern.permute.xlu0 %v660_v10 }
  0x35   : > { %342 = vperm.xlu1 %621, %v274_v0   ;;  %368 = vperm.xlu0 %625, %v274_v0  }
  0x36   : > { %622 = vset.pattern.permute.xlu2 %v659_v9 }
  0x37   : > { %346 = vperm.xlu2 %622, %v275_v4  }
  0x3d   : > { %623 = vset.pattern.permute.xlu1 %v661_v11  ;;  %629 = vset.pattern.permute.xlu0 %v654_v2 }
  0x3e   : > { %355 = vperm.xlu1 %623, %v274_v0   ;;  %v399_v0 = vand.u32 127, %v398_v54 }
  0x3f   : > { %624 = vset.pattern.permute.xlu2 %v661_v11 }
  0x40   : > { %359 = vperm.xlu2 %624, %v275_v4  }
  0x46   : > { %626 = vset.pattern.permute.xlu1 %v660_v10 }
  0x47   : > { %372 = vperm.xlu1 %626, %v275_v4   ;;  %v402_v4 = vstv %s401_s30 }
  0x48   : > { %627 = vset.pattern.permute.xlu2 %v654_v2  ;;  %vm753_vm0 = vcmp.lt.s32.totalorder %v399_v0, %v402_v4 }
  0x49   : > { %384 = vperm.xlu2 %627, %v380_v12  }
  0x4f   : > { %628 = vset.pattern.permute.xlu1 %v654_v2 }
  0x50   : > { %389 = vperm.xlu1 %628, %v381_v13  }
  0x6e   : > { %v291_v14 = vpop.permute.xlu2 %290 }
  0x76   : > { %v295_v15 = vpop.permute.xlu2 %294 }
  0x7f   : > { %v317_v23 = vpop.permute.xlu2 %316 }
  0x84   : > { %v279_v16 = vpop.permute.xlu1 %278  ;;  %v262_v17 = vpop.permute.xlu0 %261 }
  0x85   : > { %v264_v20 = vmul.f32 %v262_v17, %v257_v19 }
  0x88   : > { %v330_v28 = vpop.permute.xlu2 %329 }
  0x8c   : > { %v284_v21 = vpop.permute.xlu1 %283  ;;  %v269_v22 = vpop.permute.xlu0 %268 }
  0x8d   : > { %v271_v24 = vadd.f32 %v269_v22, %v264_v20 }
  0x8f   : > { %v272_v25 = vmul.f32 0.1, %v271_v24 }
  0x91   : > { %v273_v27 = vmax.f32 %v271_v24, %v272_v25  ;;  %v347_v36 = vpop.permute.xlu2 %346 }
  0x93   : > { %v286_v29 = vperm.slane %v273_v27, 0  ;;  %v297_v30 = vperm.slane %v273_v27, 1  ;;  %v310_v33 = vperm.slane %v273_v27, 2  ;;  %v323_v39 = vperm.slane %v273_v27, 3 }
  0x94   : > { %v336_v43 = vperm.slane %v273_v27, 4  ;;  %v349_v47 = vperm.slane %v273_v27, 5  ;;  %v362_v55 = vperm.slane %v273_v27, 6  ;;  %v375_v62 = vperm.slane %v273_v27, 7 }
  0x95   : > { %v308_v26 = vpop.permute.xlu1 %307  ;;  %v304_v31 = vpop.permute.xlu0 %303  ;;  %v287_v34 = vmul.f32 %v286_v29, %v279_v16  ;;  %v298_v35 = vmul.f32 %v297_v30, %v291_v14  ;;  %v324_v42 = vmul.f32 %v323_v39, %v317_v23  ;;  %v288_v45 = vmul.f32 %v286_v29, %v284_v21 }
  0x96   : > { %v311_v38 = vmul.f32 %v310_v33, %v304_v31  ;;  %v299_v46 = vmul.f32 %v297_v30, %v295_v15  ;;  %v337_v48 = vmul.f32 %v336_v43, %v330_v28  ;;  %v312_v52 = vmul.f32 %v310_v33, %v308_v26 }
  0x97   : > { %v300_v37 = vadd.f32 %v298_v35, %v287_v34  ;;  %v351_v11 = vmul.f32 %v349_v47, %v347_v36 }
  0x98   : > { %v301_v51 = vadd.f32 %v299_v46, %v288_v45 }
  0x99   : > { %v313_v41 = vadd.f32 %v311_v38, %v300_v37 }
  0x9a   : > { %v360_v50 = vpop.permute.xlu2 %359  ;;  %v314_v60 = vadd.f32 %v312_v52, %v301_v51 }
  0x9b   : > { %v326_v49 = vadd.f32 %v324_v42, %v313_v41  ;;  %v364_v16 = vmul.f32 %v362_v55, %v360_v50 }
  0x9d   : > { %v339_v57 = vadd.f32 %v337_v48, %v326_v49 }
  0x9e   : > { %v321_v32 = vpop.permute.xlu1 %320  ;;  %v334_v40 = vpop.permute.xlu0 %333 }
  0x9f   : > { %v325_v56 = vmul.f32 %v323_v39, %v321_v32  ;;  %v338_v6 = vmul.f32 %v336_v43, %v334_v40 }
  0xa1   : > { %v327_v1 = vadd.f32 %v325_v56, %v314_v60 }
  0xa3   : > { %v385_v5 = vpop.permute.xlu2 %384  ;;  %v340_v9 = vadd.f32 %v338_v6, %v327_v1 }
  0xa5   : > { %v353_v15 = vadd.f32 %v351_v11, %v340_v9 }
  0xa7   : > { %v343_v44 = vpop.permute.xlu1 %342  ;;  %v369_v58 = vpop.permute.xlu0 %368  ;;  %v366_v18 = vadd.f32 %v364_v16, %v353_v15 }
  0xa8   : > { %v350_v53 = vmul.f32 %v349_v47, %v343_v44  ;;  %v376_v2 = vmul.f32 %v375_v62, %v369_v58 }
  0xaa   : > { %v352_v61 = vadd.f32 %v350_v53, %v339_v57 }
  0xb0   : > { %v356_v59 = vpop.permute.xlu1 %355 }
  0xb1   : > { %v363_v63 = vmul.f32 %v362_v55, %v356_v59 }
  0xb3   : > { %v365_v3 = vadd.f32 %v363_v63, %v352_v61 }
  0xb5   : > { %v378_v7 = vadd.f32 %v376_v2, %v365_v3 }
  0xb7   : > { %v392_v10 = vadd.f32 %v385_v5, %v378_v7 }
  0xb9   : > { %v373_v12 = vpop.permute.xlu1 %372  ;;  %v406_v13 = vsel %vm753_vm0, %v392_v10, 0.0 }
  0xba   : > { %408 = vadd.xlane.f32.xlu2 %v406_v13  ;;  %v415_v14 = vmul.f32 %v406_v13, %v392_v10  ;;  %v377_v17 = vmul.f32 %v375_v62, %v373_v12 }
  0xbc   : > { %417 = vadd.xlane.f32.xlu1 %v415_v14  ;;  %v379_v19 = vadd.f32 %v377_v17, %v366_v18 }
  0xc2   : > { %v390_v20 = vpop.permute.xlu1 %389 }
  0xc3   : > { %v393_v21 = vadd.f32 %v390_v20, %v379_v19 }
  0xc5   : > { %v578_v22 = vpack.c.bf16 %v393_v21, %v392_v10  ;;  %v407_v23 = vsel %vm753_vm0, %v393_v21, 0.0 }
  0xc6   : > { %410 = vadd.xlane.f32.xlu0 %v407_v23  ;;  %v416_v24 = vmul.f32 %v407_v23, %v393_v21 }
  0xc7   : > { %579 = vst [vmem:[%s239_s9] sm:$0xff] %v578_v22  }
  0xc8   : > { %419 = vadd.xlane.f32.xlu2 %v416_v24 }
  0xce   : > { %v453_v29 = vld [vmem:[%s239_s9] sm:$0xf] (%p722_p4)  ;;  %v455_v30 = vld [vmem:[%s239_s9 + $0x4] sm:$0xf] (%p722_p4) }
  0xcf   : > { %454 = vst [vmem:[%s436_s16] sm:$0xf] (%p722_p4), %v453_v29 }
  0xd0   : > { %456 = vst [vmem:[%s436_s16 + $0x8] sm:$0xf] (%p722_p4), %v455_v30 }
 0x12d   : > { %v409_v25 = vpop.xlane.xlu2 %408 }
 0x12e   : > { %413 = vst.msk [vmem:[%s255_s13] sm:$0xff] %vm412_vm1, %v409_v25 }
 0x12f   : > { %v418_v26 = vpop.xlane.xlu1 %417 }
 0x130   : > { %421 = vst.msk [vmem:[%s255_s13 + $0x10] sm:$0xff] %vm412_vm1, %v418_v26 }
 0x138   : > { %434 = sbr.rel (!%p722_p4) target bundleno = 317 (0x13d), region = 44 }
 0x139   : > { %v411_v27 = vpop.xlane.xlu0 %410 }
 0x13a   : > { %414 = vst.msk [vmem:[%s255_s13 + $0x8] sm:$0xff] %vm412_vm1, %v411_v27 }
 0x13b   : > { %v420_v28 = vpop.xlane.xlu2 %419 }
 0x13c   : > { %422 = vst.msk [vmem:[%s255_s13 + $0x18] sm:$0xff] %vm412_vm1, %v420_v28 }
 0x13d PF: > { %p14_p8 = scmp.ge.s32.totalorder %s712_s25, 4   ;;  %s792_s21 = smov %s648_s22 }
 0x13e   : > { %s793_s22 = smov %s720_s28  ;;  %s794_s23 = smov %s712_s25 }
 0x13f   :  { %16 = sbr.rel (!%p14_p8) target bundleno = 2 (0x2), region = 123 }

</bundles_post_ra>
